<compile_context>
chip_gen: v7x
topology: tpu7x:2x2x1
jax: 0.10.0
libtpu: 0.0.40
codegen_flags: <defaults>
</compile_context>

<pallas_src>
import time
from functools import partial

import jax
import jax.numpy as jnp
from jax.experimental import pallas as pl
from jax.experimental.pallas import tpu as pltpu


_LANE = 128          # lane width / MXU alignment target for the output dim
_TOKEN_TILE = 512    # token tile when gridding (v7x-friendly VMEM footprint)


def _round_up(x: int, m: int) -> int:
    return (x + m - 1) // m * m


def _token_bucket(tokens: int) -> int:
    """Round the token count up to a small fixed set of buckets so the jitted
    call path compiles once per bucket, not once per distinct token count."""
    if tokens <= 16:
        return 16
    if tokens <= 128:
        return 1 << (tokens - 1).bit_length()          # 32, 64, 128
    if tokens <= _TOKEN_TILE:
        return _round_up(tokens, 128)
    return _round_up(tokens, _TOKEN_TILE)


def _linear_kernel(x_ref, w_ref, b_ref, o_ref):
    # f32 x is cast to bf16 in-kernel (no padded/cast HBM intermediate);
    # bf16 x bf16 -> f32 accumulation on the MXU; the f32 bias add is fused
    # with the single lane-dense (tok, 128) f32 store.
    x = x_ref[...].astype(jnp.bfloat16)
    acc = jnp.dot(x, w_ref[...], preferred_element_type=jnp.float32)
    o_ref[...] = acc + b_ref[...]


def _pallas_linear(x_p, w, b):
    """y_p = x_p @ w + b.

    x_p: (tok_p, hin) f32, w: (hin, kout_p) bf16, b: (1, kout_p) f32,
    with tok_p % 8 == 0 and kout_p % 128 == 0.
    """
    tok_p, hin = x_p.shape
    hin_w, kout_p = w.shape
    assert hin == hin_w and b.shape == (1, kout_p)
    assert tok_p % 8 == 0 and kout_p % _LANE == 0

    out_shape = jax.ShapeDtypeStruct((tok_p, kout_p), jnp.float32)

    if tok_p <= _TOKEN_TILE:
        # Single-tile problem: no grid, whole arrays as VMEM blocks
        # (no pipeline prologue/epilogue, no pointless double-buffering).
        return pl.pallas_call(
            _linear_kernel,
            out_shape=out_shape,
            in_specs=[
                pl.BlockSpec(memory_space=pltpu.MemorySpace.VMEM),
                pl.BlockSpec(memory_space=pltpu.MemorySpace.VMEM),
                pl.BlockSpec(memory_space=pltpu.MemorySpace.VMEM),
            ],
            out_specs=pl.BlockSpec(memory_space=pltpu.MemorySpace.VMEM),
        )(x_p, w, b)

    # Larger token counts: 1-D parallel grid over 512-token tiles so the two
    # v7x TensorCores share the work and per-block VMEM stays small; weight
    # and bias tiles are grid-invariant (same block every step).
    grid = (tok_p // _TOKEN_TILE,)
    return pl.pallas_call(
        _linear_kernel,
        out_shape=out_shape,
        grid_spec=pltpu.PrefetchScalarGridSpec(
            num_scalar_prefetch=0,
            grid=grid,
            in_specs=[
                pl.BlockSpec((_TOKEN_TILE, hin), lambda i: (i, 0)),
                pl.BlockSpec((hin, kout_p), lambda i: (0, 0)),
                pl.BlockSpec((1, kout_p), lambda i: (0, 0)),
            ],
            out_specs=pl.BlockSpec((_TOKEN_TILE, kout_p), lambda i: (i, 0)),
        ),
        compiler_params=pltpu.CompilerParams(
            dimension_semantics=("parallel",)),
    )(x_p, w, b)


@partial(jax.jit, static_argnames=("hidden_out",))
def _linear_forward(x, w, b, *, hidden_out):
    """Whole per-call path (token pad -> Pallas matmul -> output slice) as a
    single jitted executable: one dispatch, no eager intermediates."""
    tokens, _ = x.shape
    tok_p = _token_bucket(tokens)
    if tok_p != tokens:
        x = jnp.pad(x, ((0, tok_p - tokens), (0, 0)))
    out_p = _pallas_linear(x, w, b)
    return out_p[:tokens, :hidden_out]


class PallasLinearModule:
    """The wrapped `mod`: a small Linear layer with its hot path in Pallas.

    The weight is padded on the output dim to a 128-lane multiple and cast to
    bf16 once at init (zero padding contributes exactly 0 to the dot); the
    bias stays f32 and is pre-reshaped to (1, kout_p) once.
    """

    def __init__(self, hidden_in: int, hidden_out: int, key):
        kw, kb = jax.random.split(key)
        bound = 1.0 / (hidden_in ** 0.5)
        # Deterministic init mimicking nn.Linear's uniform(-1/sqrt(fan_in), ...)
        self.w = jax.random.uniform(
            kw, (hidden_in, hidden_out), jnp.float32, minval=-bound, maxval=bound
        )
        self.b = jax.random.uniform(
            kb, (hidden_out,), jnp.float32, minval=-bound, maxval=bound
        )
        self.hidden_in = hidden_in
        self.hidden_out = hidden_out

        # Keep padding at 128 (not 256): this layer is overhead-bound, and 128
        # already fills a v5e MXU pass / half-fills v6e-v7x in one pass.
        kout_p = _round_up(hidden_out, _LANE)
        self._kout_p = kout_p
        self._w_pad = jnp.pad(
            self.w, ((0, 0), (0, kout_p - hidden_out))
        ).astype(jnp.bfloat16)
        self._b_pad = jnp.pad(self.b, (0, kout_p - hidden_out)).reshape(1, kout_p)

    def __call__(self, x):
        assert x.ndim == 2 and x.shape[1] == self.hidden_in
        return _linear_forward(
            x, self._w_pad, self._b_pad, hidden_out=self.hidden_out
        )


class TimingWrapper:
    """JAX/Pallas analogue of the PyTorch TimingWrapper.

    forward(*args) == self.mod(*args).  When tracing is enabled, host-side
    timestamps bracket a block_until_ready'd call; when tracing is disabled
    (default), forward is a pure pass-through with no device sync so async
    dispatch pipelining across layers is preserved.
    """

    def __init__(self, rank, mod):
        self.mod = mod
        self.rank = rank
        self._tracing = False
        self.events = {"start": [], "end": []}

    def init_tracing(self):
        self.events = {"start": [], "end": []}
        self._tracing = True

    def update_tracing(self, key: str):
        assert key in self.events
        self.events[key].append(time.perf_counter())

    def finish_tracing(self):
        self._tracing = False
        # Total elapsed milliseconds across recorded (start, end) pairs.
        return sum(
            (end - start) * 1e3
            for start, end in zip(self.events["start"], self.events["end"])
        )

    def forward(self, *args):
        if not self._tracing:
            # Fast path: no per-call device sync.
            return self.mod(*args)
        self.update_tracing("start")
        out = self.mod(*args)
        jax.block_until_ready(out)  # make the host-side timing meaningful
        self.update_tracing("end")
        return out

    __call__ = forward


if __name__ == "__main__":
    key = jax.random.PRNGKey(0)
    k_x, k_mod = jax.random.split(key)

    batch, seq, hidden = 2, 8, 32
    x = jax.random.normal(k_x, (batch * seq, hidden), dtype=jnp.float32)

    inner = PallasLinearModule(hidden, hidden, k_mod)
    wrapper = TimingWrapper(rank=0, mod=inner)

    # Warm-up (jit/Mosaic compile) outside any traced interval.
    _ = jax.block_until_ready(wrapper(x))

    wrapper.init_tracing()
    out = wrapper(x)
    out = jax.block_until_ready(out)
    _ = wrapper.finish_tracing()  # timing bookkeeping, value not asserted

    # Cross-check against plain f32 JAX reference (kernel uses bf16 operands
    # with f32 accumulation, so allow bf16-level tolerance).
    ref = x @ inner.w + inner.b
    assert out.shape == (batch * seq, hidden)
    assert jnp.allclose(out, ref, atol=2e-2, rtol=2e-2), float(
        jnp.max(jnp.abs(out - ref))
    )

    print("KERNEL_OK")
</pallas_src>

<mosaic_0001>
module attributes {stable_mosaic.version = 11 : i64} {
  func.func @_linear_kernel(%arg0: memref<16x32xf32, #tpu.memory_space<vmem>>, %arg1: memref<32x128xbf16, #tpu.memory_space<vmem>>, %arg2: memref<1x128xf32, #tpu.memory_space<vmem>>, %arg3: memref<16x128xf32, #tpu.memory_space<vmem>>) attributes {dimension_semantics = [], scalar_prefetch = 0 : i64, scratch_operands = 0 : i64, tpu.core_type = #tpu.core_type<tc>} {
    %c0 = arith.constant 0 : index
    %c0_0 = arith.constant 0 : index
    %0 = vector.load %arg0[%c0, %c0_0] : memref<16x32xf32, #tpu.memory_space<vmem>>, vector<16x32xf32>
    %1 = arith.truncf %0 : vector<16x32xf32> to vector<16x32xbf16>
    %c0_1 = arith.constant 0 : index
    %c0_2 = arith.constant 0 : index
    %2 = vector.load %arg1[%c0_1, %c0_2] : memref<32x128xbf16, #tpu.memory_space<vmem>>, vector<32x128xbf16>
    %cst = arith.constant dense<0.000000e+00> : vector<16x128xf32>
    %3 = tpu.matmul %1, %2, %cst {dimension_numbers = #tpu.dot_dimension_numbers<[1], [0], [0], [1], [0, 0, 1, 1], [], []>} : vector<16x32xbf16>, vector<32x128xbf16>, vector<16x128xf32> -> vector<16x128xf32>
    %c0_3 = arith.constant 0 : index
    %c0_4 = arith.constant 0 : index
    %4 = vector.load %arg2[%c0_3, %c0_4] : memref<1x128xf32, #tpu.memory_space<vmem>>, vector<1x128xf32>
    %5 = vector.broadcast %4 : vector<1x128xf32> to vector<16x128xf32>
    %6 = arith.addf %3, %5 : vector<16x128xf32>
    %c0_5 = arith.constant 0 : index
    %c0_6 = arith.constant 0 : index
    %7 = vector.load %arg3[%c0_5, %c0_6] : memref<16x128xf32, #tpu.memory_space<vmem>>, vector<16x128xf32>
    tpu.vector_store %arg3[%c0_5, %c0_6], %6 {strides = array<i32>} : memref<16x128xf32, #tpu.memory_space<vmem>>, vector<16x128xf32>,
    return
  }
}

</mosaic_0001>

<bundles_post_ra>
// kernel: _linear_forward.1
= control target key start
LH: loop header
LB: loop body
LE: loop exit
PB: predicated region body
PF: predicated region fallthrough
CT: control target
= control target key end

     0   :  { %8 = vsyncpa [#allocation3], 0  ;;  %s307_s0 = inlined_call_operand.hbm [shape: f32[16,32], index: 0, kind: input, shape index: {}]   ;;  %s308_s1 = inlined_call_operand.hbm [shape: bf16[32,128], index: 1, kind: input, shape index: {}]   ;;  %s309_s2 = inlined_call_operand.vmem [shape: f32[1,128], index: 2, kind: input, shape index: {}]   ;;  %s310_s3 = inlined_call_operand.hbm [shape: f32[16,128], index: 3, kind: output, shape index: {}]  }
   0x1   :  { %9 = vsyncpa [#allocation6], 0 }
   0x2   :  { %10 = vsyncpa [#allocation4], 0  ;;  %s233_s12 = smov [#allocation2]   ;;  %s161_s16 = scalar_lea.hbm %s307_s0, 256 }
   0x3   :  { %s16_s13 = sshll.u32 %s233_s12, 4  ;;  %p162_p0 = scmp.ne.s32.totalorder %s307_s0, %s161_s16  ;;  %s17_s13 = int_to_ptr.vmem [resolvable:$true] %s16_s13 }
   0x4   :  { %p165_p1 = scmp.lt.u32.totalorder %s161_s16, %s307_s0 }
   0x6   :  { %p167_p2 = pnand %p165_p1, %p162_p0 }
   0x8   :  { %170 = shalt.err (!%p167_p2)
}
   0x9   :  { %s171_s21 = scalar_lea.vmem %s17_s13, 256  ;;  %p176_p4 = scmp.lt.s32.totalorder %s17_s13, %s17_s13 }
   0xa   :  { %p172_p3 = scmp.ne.s32.totalorder %s17_s13, %s171_s21  ;;  %p177_p5 = scmp.lt.s32.totalorder %s171_s21, %s171_s21 }
   0xc   :  { %p178_p6 = por %p177_p5, %p176_p4 }
   0xe   :  { %p179_p7 = pnand %p178_p6, %p172_p3 }
  0x10   :  { %182 = shalt.err (!%p179_p7)
}
  0x11   :  { %s234_s22 = smov 128   ;;  %s235_s23 = smov 8  }
  0x12   :  { %22 = dma.hbm_to_vmem [thread:$0]  %s307_s0, 256, %s17_s13, [#allocation3], %s234_s22, %s234_s22, %s235_s23  }
  0x13   :  { %s236_s26 = smov [#allocation5]   ;;  %s183_s30 = scalar_lea.hbm %s308_s1, 256 }
  0x14   :  { %s28_s27 = sshll.u32 %s236_s26, 4  ;;  %p184_p8 = scmp.ne.s32.totalorder %s308_s1, %s183_s30  ;;  %s29_s27 = int_to_ptr.vmem [resolvable:$true] %s28_s27 }
  0x15   :  { %p187_p9 = scmp.lt.u32.totalorder %s183_s30, %s308_s1 }
  0x17   :  { %p189_p10 = pnand %p187_p9, %p184_p8 }
  0x19   :  { %192 = shalt.err (!%p189_p10)
}
  0x1a   :  { %s193_s8 = scalar_lea.vmem %s29_s27, 256  ;;  %p198_p12 = scmp.lt.s32.totalorder %s29_s27, %s29_s27 }
  0x1b   :  { %p194_p11 = scmp.ne.s32.totalorder %s29_s27, %s193_s8  ;;  %p199_p13 = scmp.lt.s32.totalorder %s193_s8, %s193_s8 }
  0x1d   :  { %p200_p0 = por %p199_p13, %p198_p12 }
  0x1f   :  { %p201_p1 = pnand %p200_p0, %p194_p11 }
  0x21   :  { %204 = shalt.err (!%p201_p1)
}
  0x22   :  { %s237_s0 = smov 64   ;;  %s238_s9 = smov 4  }
  0x23   :  { %34 = dma.hbm_to_vmem [thread:$0]  %s308_s1, 256, %s29_s27, [#allocation6], %s237_s0, %s237_s0, %s238_s9  }
  0x24   :  { %227 = dma.done.wait [#allocation3], 256  }
  0x25   :  { %228 = vsyncadd [#allocation3], 4294967040 }
  0x26   :  { %229 = dma.done.wait [#allocation6], 256  }
  0x27   :  { %230 = vsyncadd [#allocation6], 4294967040  ;;  %v239_v0 = vmov 0.0   ;;  %vm240_vm0 = vmmov 0   ;;  %v159_v1 = vld [vmem:[#allocation5] sm:$0xff]   ;;  %v160_v2 = vld [vmem:[#allocation5 + $0x8] sm:$0xff]  }
  0x28   :  { %142 = vmatprep.subr.bf16.mxu0 %v239_v0  ;;  %146 = vmatprep.mubr.msk.bf16.mxu0 %vm240_vm0, %v239_v0  ;;  %v44_v3 = vld [vmem:[#allocation2] sm:$0xff]  ;;  %v45_v4 = vld [vmem:[#allocation2 + $0x8] sm:$0xff]  ;;  %vm70_vm1 = vcmask 261120   ;;  %s241_s13 = smov [#allocation7]  }
  0x29   :  { %143 = vmatpush3.bf16.msra.mxu0 %v159_v1  ;;  %v46_v5 = vpack.c.bf16 %v45_v4, %v44_v3  ;;  %v135_v6 = vld [vmem:[%s309_s2] ss:$0 sm:$0xff]  ;;  %s122_s14 = sshll.u32 %s241_s13, 4  ;;  %s123_s14 = int_to_ptr.vmem [resolvable:$true] %s122_s14 }
  0x2a   :  { %144 = vmatprep.subr.bf16.mxu0 %v239_v0  ;;  %s205_s15 = scalar_lea.vmem %s123_s14, 256  ;;  %p210_p3 = scmp.lt.s32.totalorder %s123_s14, %s123_s14 }
  0x2b   :  { %p206_p2 = scmp.ne.s32.totalorder %s123_s14, %s205_s15  ;;  %p211_p4 = scmp.lt.s32.totalorder %s205_s15, %s205_s15 }
  0x2d   :  { %145 = vmatpush3.bf16.msra.mxu0 %v160_v2  ;;  %p212_p5 = por %p211_p4, %p210_p3 }
  0x2f   :  { %p213_p6 = pnand %p212_p5, %p206_p2 }
  0x30   :  { %147 = vmatmul.mubr.msk.bf16.vlgmr.msra.gmra.mrb[0].mxu0 %vm70_vm1, %v46_v5 }
 0x103   :  { %v108_v7 = vpop.f32.mrb[0].mxu0 }
 0x104   :  { %v109_v8 = vadd.f32 %v135_v6, %v108_v7  ;;  %v148_v9 = vpop.f32.mrb[1].mxu0 }
 0x105   :  { %v111_v10 = vpop.f32.mrb[2].mxu0 }
 0x106   :  { %115 = vst [vmem:[#allocation7] sm:$0xff] %v109_v8  ;;  %v112_v11 = vadd.f32 %v135_v6, %v111_v10  ;;  %v149_v12 = vpop.f32.mrb[3].mxu0 }
 0x108   :  { %116 = vst [vmem:[#allocation7 + $0x8] sm:$0xff] %v112_v11 }
 0x109   :  { %216 = shalt.err (!%p213_p6)
}
 0x10a   :  { %s217_s17 = scalar_lea.hbm %s310_s3, 256 }
 0x10b   :  { %p218_p7 = scmp.ne.s32.totalorder %s310_s3, %s217_s17  ;;  %p221_p8 = scmp.lt.u32.totalorder %s217_s17, %s310_s3 }
 0x10d   :  { %p223_p9 = pnand %p221_p8, %p218_p7 }
 0x10f   :  { %226 = shalt.err (!%p223_p9)
}
 0x110   :  { %128 = dma.vmem_to_hbm [thread:$0]  %s123_s14, 256, %s310_s3, [#allocation4], %s234_s22, %s234_s22, %s235_s23  }
 0x111   :  { %231 = dma.done.wait [#allocation4], 256  }
 0x112   :  { %232 = vsyncadd [#allocation4], 4294967040 }
 0x113   :  { %132 = vsyncpa [#allocation3], 1 }
 0x114   :  { %133 = vsyncpa [#allocation6], 1 }
 0x115   :  { %134 = vsyncpa [#allocation4], 1 }

</bundles_post_ra>
